<compile_context>
chip_gen: v6e
topology: v6e:2x2x1
jax: 0.10.0
libtpu: 0.0.40
codegen_flags: <defaults>
</compile_context>

<pallas_src>
from math import sqrt

import numpy as np

import jax
import jax.numpy as jnp
from jax import lax
from jax.experimental import pallas as pl
from jax.experimental.pallas import tpu as pltpu


def _round_up(x, m):
    return (x + m - 1) // m * m


def prepare_params(params):
    """One-time host-side packing (call at param-load time, NOT per forward).

    params: list of 6 (W (out, in), b (out,)) exactly as PyTorch stores them.
    Returns (w_packed (6, D, D), b_packed (6, D, 1), dims) with zero padding.
    """
    dims = tuple([params[0][0].shape[1]] + [w.shape[0] for (w, _) in params])
    n_layers = len(params)
    D = _round_up(max(dims), 8)
    w_np = np.zeros((n_layers, D, D), np.float32)
    b_np = np.zeros((n_layers, D, 1), np.float32)
    for l, (w, b) in enumerate(params):
        w = np.asarray(w, np.float32)
        b = np.asarray(b, np.float32)
        out_d, in_d = w.shape
        w_np[l, :out_d, :in_d] = w
        b_np[l, :out_d, 0] = b
    return jnp.asarray(w_np), jnp.asarray(b_np), dims


def make_autoencoder_forward(dims, max_tb=1024):
    """Build a jitted forward for the static layer dims returned by prepare_params."""
    n_layers = len(dims) - 1
    P = tuple(_round_up(d, 8) for d in dims)   # per-layer padded dims (8-aligned sublanes)
    D = max(P)
    n_features = dims[0]
    latent_dim = dims[3]
    LAT_P = P[3]
    OUT_P = P[6]

    def kernel(w_ref, b_ref, x_ref, latT_ref, reconT_ref):
        f32 = jnp.float32
        # Layer 0: natural-layout x tile (TB, P0) contracted lane-with-lane against W0
        # (out, in) -> transposed activation (P1, TB); transpose happens in-kernel.
        h = lax.dot_general(
            w_ref[0, :P[1], :P[0]], x_ref[...],
            dimension_numbers=(((1,), (1,)), ((), ())),
            preferred_element_type=f32)
        h = jnp.tanh(h + b_ref[0, :P[1]])
        h = jnp.tanh(jnp.dot(w_ref[1, :P[2], :P[1]], h,
                             preferred_element_type=f32) + b_ref[1, :P[2]])
        z = jnp.dot(w_ref[2, :P[3], :P[2]], h,
                    preferred_element_type=f32) + b_ref[2, :P[3]]
        latT_ref[...] = z
        d = jnp.tanh(jnp.dot(w_ref[3, :P[4], :P[3]], z,
                             preferred_element_type=f32) + b_ref[3, :P[4]])
        d = jnp.tanh(jnp.dot(w_ref[4, :P[5], :P[4]], d,
                             preferred_element_type=f32) + b_ref[4, :P[5]])
        reconT_ref[...] = jnp.dot(w_ref[5, :P[6], :P[5]], d,
                                  preferred_element_type=f32) + b_ref[5, :P[6]]

    @jax.jit
    def forward(x, w_packed, b_packed):
        batch = x.shape[0]
        assert x.shape[1] == n_features

        # Batch tile on the lane axis: multiple of 128; >= 2 tiles for moderate batches
        # so the "parallel" grid axis can shard across TensorCores.
        if batch <= 128:
            TB = 128
        else:
            TB = min(max_tb, _round_up((batch + 1) // 2, 128))
        batch_pad = _round_up(batch, TB)

        # Natural-layout input; only pad (no transpose), and skip padding when not needed.
        if (batch, n_features) != (batch_pad, P[0]):
            x_p = (jnp.zeros((batch_pad, P[0]), jnp.float32)
                   .at[:batch, :n_features].set(x.astype(jnp.float32)))
        else:
            x_p = x.astype(jnp.float32)

        grid = (batch_pad // TB,)

        flops = 2 * sum(P[l + 1] * P[l] for l in range(n_layers)) * batch_pad
        cost = pl.CostEstimate(
            flops=flops,
            transcendentals=(P[1] + P[2] + P[4] + P[5]) * batch_pad,
            bytes_accessed=4 * (batch_pad * (P[0] + LAT_P + OUT_P)
                                + n_layers * D * D + n_layers * D),
        )

        # Explicit VMEM budget (v5e scoped default 16 MiB, v7x 32 of 64 MiB).
        w_bytes = n_layers * D * D * 4
        b_bytes = n_layers * D * 128 * 4            # (D,1) blocks occupy full lane tiles
        tile_bytes = 4 * TB * (P[0] + LAT_P + OUT_P)
        needed = 2 * (w_bytes + b_bytes + tile_bytes)  # double-buffered worst case
        vmem_limit = int(min(max(2 * needed + (1 << 20), 16 << 20), 48 << 20))

        latT, reconT = pl.pallas_call(
            kernel,
            grid=grid,
            in_specs=[
                pl.BlockSpec((n_layers, D, D), lambda i: (0, 0, 0)),  # weights, resident
                pl.BlockSpec((n_layers, D, 1), lambda i: (0, 0, 0)),  # biases, resident
                pl.BlockSpec((TB, P[0]), lambda i: (i, 0)),           # x batch tile (natural)
            ],
            out_specs=(
                pl.BlockSpec((LAT_P, TB), lambda i: (0, i)),          # latent^T tile (shrunk rows)
                pl.BlockSpec((OUT_P, TB), lambda i: (0, i)),          # recon^T tile
            ),
            out_shape=(
                jax.ShapeDtypeStruct((LAT_P, batch_pad), jnp.float32),
                jax.ShapeDtypeStruct((OUT_P, batch_pad), jnp.float32),
            ),
            compiler_params=pltpu.CompilerParams(
                dimension_semantics=("parallel",),
                vmem_limit_bytes=vmem_limit,
            ),
            cost_estimate=cost,
        )(w_packed, b_packed, x_p)

        latent = latT[:latent_dim, :batch].T
        recon = reconT[:n_features, :batch].T
        return latent, recon

    return forward


def make_params(n_features, key):
    """Deterministic init mirroring nn.Linear default: U(-1/sqrt(fan_in), +1/sqrt(fan_in)).
    Weights kept in native PyTorch (out, in) layout."""
    h1 = round(n_features * 0.75)
    h2 = round(n_features * 0.5)
    latent = round(sqrt(n_features)) + 1
    layer_dims = [
        (n_features, h1), (h1, h2), (h2, latent),        # encoder
        (latent, h2), (h2, h1), (h1, n_features),        # decoder
    ]
    params = []
    for (fan_in, fan_out) in layer_dims:
        key, kw, kb = jax.random.split(key, 3)
        bound = 1.0 / sqrt(fan_in)
        w = jax.random.uniform(kw, (fan_out, fan_in), jnp.float32, -bound, bound)
        b = jax.random.uniform(kb, (fan_out,), jnp.float32, -bound, bound)
        params.append((w, b))
    return params


def reference_forward(x, params):
    """Plain-JAX reference reproducing the PyTorch forward semantics (exact f32 matmuls)."""
    hp = jax.lax.Precision.HIGHEST
    h = jnp.tanh(jnp.dot(x, params[0][0].T, precision=hp) + params[0][1])
    h = jnp.tanh(jnp.dot(h, params[1][0].T, precision=hp) + params[1][1])
    z = jnp.dot(h, params[2][0].T, precision=hp) + params[2][1]
    d = jnp.tanh(jnp.dot(z, params[3][0].T, precision=hp) + params[3][1])
    d = jnp.tanh(jnp.dot(d, params[4][0].T, precision=hp) + params[4][1])
    r = jnp.dot(d, params[5][0].T, precision=hp) + params[5][1]
    return z, r


if __name__ == "__main__":
    n_features = 32
    batch = 8

    key = jax.random.PRNGKey(0)
    key, kx = jax.random.split(key)
    x = jax.random.normal(kx, (batch, n_features), jnp.float32)
    params = make_params(n_features, key)

    # One-time param packing (hoisted out of the jitted forward).
    w_packed, b_packed, dims = prepare_params(params)
    forward = make_autoencoder_forward(dims)

    latent_z, x_recon = forward(x, w_packed, b_packed)
    jax.block_until_ready((latent_z, x_recon))

    z_ref, r_ref = reference_forward(x, params)
    latent_dim = round(sqrt(n_features)) + 1
    assert latent_z.shape == (batch, latent_dim)
    assert x_recon.shape == (batch, n_features)
    assert jnp.allclose(latent_z, z_ref, atol=1e-4, rtol=1e-4)
    assert jnp.allclose(x_recon, r_ref, atol=1e-4, rtol=1e-4)

    print("KERNEL_OK")
</pallas_src>

<mosaic_0001>
module attributes {stable_mosaic.version = 11 : i64} {
  func.func @kernel(%arg0: i32, %arg1: memref<6x32x32xf32, #tpu.memory_space<vmem>>, %arg2: memref<6x32x1xf32, #tpu.memory_space<vmem>>, %arg3: memref<128x32xf32, #tpu.memory_space<vmem>>, %arg4: memref<8x128xf32, #tpu.memory_space<vmem>>, %arg5: memref<32x128xf32, #tpu.memory_space<vmem>>) attributes {dimension_semantics = [#tpu.dimension_semantics<parallel>], iteration_bounds = array<i64: 1>, scalar_prefetch = 0 : i64, scratch_operands = 0 : i64, tpu.core_type = #tpu.core_type<tc>, window_params = [{pipeline_mode = #tpu.pipeline_mode<synchronous>, transform_indices = @transform_0, window_bounds = array<i64: 6, 32, 32>}, {pipeline_mode = #tpu.pipeline_mode<synchronous>, transform_indices = @transform_1, window_bounds = array<i64: 6, 32, 1>}, {transform_indices = @transform_2, window_bounds = array<i64: 128, 32>}, {transform_indices = @transform_3, window_bounds = array<i64: 8, 128>}, {transform_indices = @transform_4, window_bounds = array<i64: 32, 128>}]} {
    %c0 = arith.constant 0 : index
    %c0_0 = arith.constant 0 : index
    %c0_1 = arith.constant 0 : index
    %0 = vector.load %arg1[%c0, %c0_0, %c0_1] : memref<6x32x32xf32, #tpu.memory_space<vmem>>, vector<1x24x32xf32>
    %1 = vector.shape_cast %0 : vector<1x24x32xf32> to vector<24x32xf32>
    %c0_2 = arith.constant 0 : index
    %c0_3 = arith.constant 0 : index
    %2 = vector.load %arg3[%c0_2, %c0_3] : memref<128x32xf32, #tpu.memory_space<vmem>>, vector<128x32xf32>
    %cst = arith.constant dense<0.000000e+00> : vector<24x128xf32>
    %3 = tpu.matmul %1, %2, %cst {dimension_numbers = #tpu.dot_dimension_numbers<[1], [1], [0], [0], [0, 0, 1, 0], [], []>} : vector<24x32xf32>, vector<128x32xf32>, vector<24x128xf32> -> vector<24x128xf32>
    %c0_4 = arith.constant 0 : index
    %c0_5 = arith.constant 0 : index
    %c0_6 = arith.constant 0 : index
    %4 = vector.load %arg2[%c0_4, %c0_5, %c0_6] : memref<6x32x1xf32, #tpu.memory_space<vmem>>, vector<1x24x1xf32>
    %5 = vector.shape_cast %4 : vector<1x24x1xf32> to vector<24x1xf32>
    %6 = vector.broadcast %5 : vector<24x1xf32> to vector<24x128xf32>
    %7 = arith.addf %3, %6 : vector<24x128xf32>
    %8 = math.tanh %7 : vector<24x128xf32>
    %c1 = arith.constant 1 : index
    %c0_7 = arith.constant 0 : index
    %c0_8 = arith.constant 0 : index
    %9 = vector.load %arg1[%c1, %c0_7, %c0_8] : memref<6x32x32xf32, #tpu.memory_space<vmem>>, vector<1x16x24xf32>
    %10 = vector.shape_cast %9 : vector<1x16x24xf32> to vector<16x24xf32>
    %cst_9 = arith.constant dense<0.000000e+00> : vector<16x128xf32>
    %11 = tpu.matmul %10, %8, %cst_9 {dimension_numbers = #tpu.dot_dimension_numbers<[1], [0], [0], [1], [0, 0, 1, 1], [], []>} : vector<16x24xf32>, vector<24x128xf32>, vector<16x128xf32> -> vector<16x128xf32>
    %c1_10 = arith.constant 1 : index
    %c0_11 = arith.constant 0 : index
    %c0_12 = arith.constant 0 : index
    %12 = vector.load %arg2[%c1_10, %c0_11, %c0_12] : memref<6x32x1xf32, #tpu.memory_space<vmem>>, vector<1x16x1xf32>
    %13 = vector.shape_cast %12 : vector<1x16x1xf32> to vector<16x1xf32>
    %14 = vector.broadcast %13 : vector<16x1xf32> to vector<16x128xf32>
    %15 = arith.addf %11, %14 : vector<16x128xf32>
    %16 = math.tanh %15 : vector<16x128xf32>
    %c2 = arith.constant 2 : index
    %c0_13 = arith.constant 0 : index
    %c0_14 = arith.constant 0 : index
    %17 = vector.load %arg1[%c2, %c0_13, %c0_14] : memref<6x32x32xf32, #tpu.memory_space<vmem>>, vector<1x8x16xf32>
    %18 = vector.shape_cast %17 : vector<1x8x16xf32> to vector<8x16xf32>
    %cst_15 = arith.constant dense<0.000000e+00> : vector<8x128xf32>
    %19 = tpu.matmul %18, %16, %cst_15 {dimension_numbers = #tpu.dot_dimension_numbers<[1], [0], [0], [1], [0, 0, 1, 1], [], []>} : vector<8x16xf32>, vector<16x128xf32>, vector<8x128xf32> -> vector<8x128xf32>
    %c2_16 = arith.constant 2 : index
    %c0_17 = arith.constant 0 : index
    %c0_18 = arith.constant 0 : index
    %20 = vector.load %arg2[%c2_16, %c0_17, %c0_18] : memref<6x32x1xf32, #tpu.memory_space<vmem>>, vector<1x8x1xf32>
    %21 = vector.shape_cast %20 : vector<1x8x1xf32> to vector<8x1xf32>
    %22 = vector.broadcast %21 : vector<8x1xf32> to vector<8x128xf32>
    %23 = arith.addf %19, %22 : vector<8x128xf32>
    %c0_19 = arith.constant 0 : index
    %c0_20 = arith.constant 0 : index
    %24 = vector.load %arg4[%c0_19, %c0_20] : memref<8x128xf32, #tpu.memory_space<vmem>>, vector<8x128xf32>
    tpu.vector_store %arg4[%c0_19, %c0_20], %23 {strides = array<i32>} : memref<8x128xf32, #tpu.memory_space<vmem>>, vector<8x128xf32>,
    %c3 = arith.constant 3 : index
    %c0_21 = arith.constant 0 : index
    %c0_22 = arith.constant 0 : index
    %25 = vector.load %arg1[%c3, %c0_21, %c0_22] : memref<6x32x32xf32, #tpu.memory_space<vmem>>, vector<1x16x8xf32>
    %26 = vector.shape_cast %25 : vector<1x16x8xf32> to vector<16x8xf32>
    %cst_23 = arith.constant dense<0.000000e+00> : vector<16x128xf32>
    %27 = tpu.matmul %26, %23, %cst_23 {dimension_numbers = #tpu.dot_dimension_numbers<[1], [0], [0], [1], [0, 0, 1, 1], [], []>} : vector<16x8xf32>, vector<8x128xf32>, vector<16x128xf32> -> vector<16x128xf32>
    %c3_24 = arith.constant 3 : index
    %c0_25 = arith.constant 0 : index
    %c0_26 = arith.constant 0 : index
    %28 = vector.load %arg2[%c3_24, %c0_25, %c0_26] : memref<6x32x1xf32, #tpu.memory_space<vmem>>, vector<1x16x1xf32>
    %29 = vector.shape_cast %28 : vector<1x16x1xf32> to vector<16x1xf32>
    %30 = vector.broadcast %29 : vector<16x1xf32> to vector<16x128xf32>
    %31 = arith.addf %27, %30 : vector<16x128xf32>
    %32 = math.tanh %31 : vector<16x128xf32>
    %c4 = arith.constant 4 : index
    %c0_27 = arith.constant 0 : index
    %c0_28 = arith.constant 0 : index
    %33 = vector.load %arg1[%c4, %c0_27, %c0_28] : memref<6x32x32xf32, #tpu.memory_space<vmem>>, vector<1x24x16xf32>
    %34 = vector.shape_cast %33 : vector<1x24x16xf32> to vector<24x16xf32>
    %cst_29 = arith.constant dense<0.000000e+00> : vector<24x128xf32>
    %35 = tpu.matmul %34, %32, %cst_29 {dimension_numbers = #tpu.dot_dimension_numbers<[1], [0], [0], [1], [0, 0, 1, 1], [], []>} : vector<24x16xf32>, vector<16x128xf32>, vector<24x128xf32> -> vector<24x128xf32>
    %c4_30 = arith.constant 4 : index
    %c0_31 = arith.constant 0 : index
    %c0_32 = arith.constant 0 : index
    %36 = vector.load %arg2[%c4_30, %c0_31, %c0_32] : memref<6x32x1xf32, #tpu.memory_space<vmem>>, vector<1x24x1xf32>
    %37 = vector.shape_cast %36 : vector<1x24x1xf32> to vector<24x1xf32>
    %38 = vector.broadcast %37 : vector<24x1xf32> to vector<24x128xf32>
    %39 = arith.addf %35, %38 : vector<24x128xf32>
    %40 = math.tanh %39 : vector<24x128xf32>
    %c5 = arith.constant 5 : index
    %c0_33 = arith.constant 0 : index
    %c0_34 = arith.constant 0 : index
    %41 = vector.load %arg1[%c5, %c0_33, %c0_34] : memref<6x32x32xf32, #tpu.memory_space<vmem>>, vector<1x32x24xf32>
    %42 = vector.shape_cast %41 : vector<1x32x24xf32> to vector<32x24xf32>
    %cst_35 = arith.constant dense<0.000000e+00> : vector<32x128xf32>
    %43 = tpu.matmul %42, %40, %cst_35 {dimension_numbers = #tpu.dot_dimension_numbers<[1], [0], [0], [1], [0, 0, 1, 1], [], []>} : vector<32x24xf32>, vector<24x128xf32>, vector<32x128xf32> -> vector<32x128xf32>
    %c5_36 = arith.constant 5 : index
    %c0_37 = arith.constant 0 : index
    %c0_38 = arith.constant 0 : index
    %44 = vector.load %arg2[%c5_36, %c0_37, %c0_38] : memref<6x32x1xf32, #tpu.memory_space<vmem>>, vector<1x32x1xf32>
    %45 = vector.shape_cast %44 : vector<1x32x1xf32> to vector<32x1xf32>
    %46 = vector.broadcast %45 : vector<32x1xf32> to vector<32x128xf32>
    %47 = arith.addf %43, %46 : vector<32x128xf32>
    %c0_39 = arith.constant 0 : index
    %c0_40 = arith.constant 0 : index
    %48 = vector.load %arg5[%c0_39, %c0_40] : memref<32x128xf32, #tpu.memory_space<vmem>>, vector<32x128xf32>
    tpu.vector_store %arg5[%c0_39, %c0_40], %47 {strides = array<i32>} : memref<32x128xf32, #tpu.memory_space<vmem>>, vector<32x128xf32>,
    return
  }
  func.func @transform_0(%arg0: i32) -> (i32, i32, i32) {
    %c0_i32 = arith.constant 0 : i32
    %c0_i32_0 = arith.constant 0 : i32
    %c0_i32_1 = arith.constant 0 : i32
    %c0_i32_2 = arith.constant 0 : i32
    return %c0_i32, %c0_i32_0, %c0_i32_1 : i32, i32, i32
  }
  func.func @transform_1(%arg0: i32) -> (i32, i32, i32) {
    %c0_i32 = arith.constant 0 : i32
    %c0_i32_0 = arith.constant 0 : i32
    %c0_i32_1 = arith.constant 0 : i32
    %c0_i32_2 = arith.constant 0 : i32
    return %c0_i32, %c0_i32_0, %c0_i32_1 : i32, i32, i32
  }
  func.func @transform_2(%arg0: i32) -> (i32, i32) {
    %c0_i32 = arith.constant 0 : i32
    %c0_i32_0 = arith.constant 0 : i32
    return %arg0, %c0_i32 : i32, i32
  }
  func.func @transform_3(%arg0: i32) -> (i32, i32) {
    %c0_i32 = arith.constant 0 : i32
    %c0_i32_0 = arith.constant 0 : i32
    return %c0_i32, %arg0 : i32, i32
  }
  func.func @transform_4(%arg0: i32) -> (i32, i32) {
    %c0_i32 = arith.constant 0 : i32
    %c0_i32_0 = arith.constant 0 : i32
    return %c0_i32, %arg0 : i32, i32
  }
}

</mosaic_0001>

<bundles_post_ra>
// kernel: forward.1
= control target key start
LH: loop header
LB: loop body
LE: loop exit
PB: predicated region body
PF: predicated region fallthrough
CT: control target
= control target key end

     0   :  { %vm53_vm0 = vcmask 261120   ;;  %v941_v0 = vmov 0.0   ;;  %vm942_vm1 = vmmov 0   ;;  %v943_v2 = vmov 0   ;;  %s1185_s2 = inlined_call_operand.vmem [shape: f32[128,32], index: 2, kind: input, shape index: {}]   ;;  %s1186_s1 = inlined_call_operand.vmem [shape: f32[6,32,1], index: 1, kind: input, shape index: {}]   ;;  %s1187_s0 = inlined_call_operand.vmem [shape: f32[6,32,32], index: 0, kind: input, shape index: {}]   ;;  %s1188_s3 = inlined_call_operand.vmem [shape: f32[8,128], index: 3, kind: output, shape index: {0}]   ;;  %s1189_s4 = inlined_call_operand.vmem [shape: f32[32,128], index: 4, kind: output, shape index: {1}]  }
   0x1   :  { %829 = vmatprep.subr.mxu0 %v941_v0  ;;  %v34_v1 = vld [vmem:[%s1185_s2 + $0x78] sm:$0xff]  ;;  %861 = vmatprep.mubr.msk.f32.mxu0 %vm942_vm1, %v941_v0  ;;  %v33_v3 = vld [vmem:[%s1185_s2 + $0x70] sm:$0xff]  ;;  %v32_v4 = vld [vmem:[%s1185_s2 + $0x68] sm:$0xff]  ;;  %vm210_vm2 = vcmask 195584   ;;  %vm303_vm3 = vcmask 130048   ;;  %vm394_vm4 = vcmask 64512  }
   0x2   :  { %830 = vmatpush3.xpose.msk.msra.mxu0 %vm53_vm0, %v34_v1  ;;  %919 = vset.pattern.permute.xlu0 %v943_v2  ;;  %v37_v5 = vld [vmem:[%s1186_s1 + $0x10] sm:$0xff]  ;;  %v35_v6 = vld [vmem:[%s1186_s1] sm:$0xff]  ;;  %v36_v7 = vld [vmem:[%s1186_s1 + $0x8] sm:$0xff] }
   0x3   :  { %831 = vmatprep.subr.mxu0 %v941_v0  ;;  %920 = vset.pattern.permute.xlu1 %v943_v2  ;;  %v754_v8 = vld [vmem:[%s1186_s1 + $0x28] sm:$0xff]  ;;  %v31_v9 = vld [vmem:[%s1185_s2 + $0x60] sm:$0xff]  ;;  %v30_v12 = vld [vmem:[%s1185_s2 + $0x58] sm:$0xff] }
   0x4   :  { %50 = vperm.xlu0 %919, %v37_v5   ;;  %40 = vperm.xlu1 %920, %v35_v6   ;;  %v753_v10 = vld [vmem:[%s1186_s1 + $0x20] sm:$0xff]  ;;  %v763_v13 = vld [vmem:[%s1186_s1 + $0x68] sm:$0xff]  ;;  %v29_v15 = vld [vmem:[%s1185_s2 + $0x50] sm:$0xff] }
   0x5   :  { %v758_v11 = vld [vmem:[%s1186_s1 + $0x40] sm:$0xff]  ;;  %v771_v16 = vld [vmem:[%s1186_s1 + $0x90] sm:$0xff]  ;;  %v770_v17 = vld [vmem:[%s1186_s1 + $0x88] sm:$0xff] }
   0x6   :  { %832 = vmatpush3.xpose.msk.msra.mxu0 %vm53_vm0, %v33_v3  ;;  %v762_v14 = vld [vmem:[%s1186_s1 + $0x60] sm:$0xff]  ;;  %v28_v18 = vld [vmem:[%s1185_s2 + $0x48] sm:$0xff]  ;;  %v781_v23 = vld [vmem:[%s1186_s1 + $0xb0] sm:$0xff] }
   0x7   :  { %833 = vmatprep.subr.mxu0 %v941_v0  ;;  %v769_v19 = vld [vmem:[%s1186_s1 + $0x80] sm:$0xff]  ;;  %v780_v22 = vld [vmem:[%s1186_s1 + $0xa8] sm:$0xff]  ;;  %v26_v24 = vld [vmem:[%s1185_s2 + $0x38] sm:$0xff] }
   0x8   :  { %45 = vperm.xlu0 %919, %v36_v7   ;;  %207 = vperm.xlu1 %920, %v754_v8   ;;  %v779_v20 = vld [vmem:[%s1186_s1 + $0xa0] sm:$0xff]  ;;  %v782_v25 = vld [vmem:[%s1186_s1 + $0xb8] sm:$0xff]  ;;  %v25_v26 = vld [vmem:[%s1185_s2 + $0x30] sm:$0xff] }
   0x9   :  { %v27_v21 = vld [vmem:[%s1185_s2 + $0x40] sm:$0xff]  ;;  %v24_v27 = vld [vmem:[%s1185_s2 + $0x28] sm:$0xff]  ;;  %v22_v29 = vld [vmem:[%s1185_s2 + $0x18] sm:$0xff] }
   0xa   :  { %834 = vmatpush3.xpose.msk.msra.mxu0 %vm53_vm0, %v32_v4  ;;  %v23_v28 = vld [vmem:[%s1185_s2 + $0x20] sm:$0xff]  ;;  %v21_v30 = vld [vmem:[%s1185_s2 + $0x10] sm:$0xff]  ;;  %v20_v31 = vld [vmem:[%s1185_s2 + $0x8] sm:$0xff] }
   0xb   :  { %835 = vmatprep.subr.mxu0 %v941_v0  ;;  %v19_v32 = vld [vmem:[%s1185_s2] sm:$0xff]  ;;  %v17_v34 = vld [vmem:[%s1187_s0 + $0x8] sm:$0xff]  ;;  %v18_v35 = vld [vmem:[%s1187_s0 + $0x10] sm:$0xff] }
   0xc   :  { %202 = vperm.xlu0 %919, %v753_v10   ;;  %300 = vperm.xlu1 %920, %v758_v11   ;;  %v16_v33 = vld [vmem:[%s1187_s0] sm:$0xff]  ;;  %v752_v52 = vld [vmem:[%s1187_s0 + $0x28] sm:$0xff] }
   0xd   :  { %v751_v36 = vld [vmem:[%s1187_s0 + $0x20] sm:$0xff]  ;;  %v761_v4 = vld [vmem:[%s1187_s0 + $0x68] sm:$0xff] }
   0xe   :  { %836 = vmatpush3.xpose.msk.msra.mxu0 %vm53_vm0, %v31_v9  ;;  %876 = vmatprep.mubr.msk.f32.mxu1 %vm210_vm2, %v751_v36  ;;  %v757_v60 = vld [vmem:[%s1187_s0 + $0x40] sm:$0xff] }
   0xf   :  { %837 = vmatprep.subr.mxu0 %v941_v0  ;;  %v760_v62 = vld [vmem:[%s1187_s0 + $0x60] sm:$0xff] }
  0x10   :  { %391 = vperm.xlu0 %919, %v763_v13   ;;  %386 = vperm.xlu1 %920, %v762_v14   ;;  %v767_v14 = vld [vmem:[%s1187_s0 + $0x88] sm:$0xff] }
  0x12   :  { %838 = vmatpush3.xpose.msk.msra.mxu0 %vm53_vm0, %v30_v12  ;;  %v766_v12 = vld [vmem:[%s1187_s0 + $0x80] sm:$0xff] }
  0x13   :  { %839 = vmatprep.subr.mxu0 %v941_v0 }
  0x14   :  { %498 = vperm.xlu0 %919, %v771_v16   ;;  %493 = vperm.xlu1 %920, %v770_v17   ;;  %v775_v16 = vld [vmem:[%s1187_s0 + $0xa0] sm:$0xff] }
  0x16   :  { %840 = vmatpush3.xpose.msk.msra.mxu0 %vm53_vm0, %v29_v15  ;;  %v768_v15 = vld [vmem:[%s1187_s0 + $0x90] sm:$0xff] }
  0x17   :  { %841 = vmatprep.subr.mxu0 %v941_v0 }
  0x18   :  { %488 = vperm.xlu0 %919, %v769_v19   ;;  %605 = vperm.xlu1 %920, %v779_v20  }
  0x1a   :  { %842 = vmatpush3.xpose.msk.msra.mxu0 %vm53_vm0, %v28_v18 }
  0x1b   :  { %843 = vmatprep.subr.mxu0 %v941_v0 }
  0x1c   :  { %610 = vperm.xlu0 %919, %v780_v22   ;;  %615 = vperm.xlu1 %920, %v781_v23  }
  0x1e   :  { %844 = vmatpush3.xpose.msk.msra.mxu0 %vm53_vm0, %v27_v21 }
  0x1f   :  { %845 = vmatprep.subr.mxu0 %v941_v0 }
  0x20   :  { %620 = vperm.xlu0 %919, %v782_v25  }
  0x22   :  { %846 = vmatpush3.xpose.msk.msra.mxu0 %vm53_vm0, %v26_v24 }
  0x23   :  { %847 = vmatprep.subr.mxu0 %v941_v0 }
  0x26   :  { %848 = vmatpush3.xpose.msk.msra.mxu0 %vm53_vm0, %v25_v26 }
  0x27   :  { %849 = vmatprep.subr.mxu0 %v941_v0 }
  0x2a   :  { %850 = vmatpush3.xpose.msk.msra.mxu0 %vm53_vm0, %v24_v27 }
  0x2b   :  { %851 = vmatprep.subr.mxu0 %v941_v0 }
  0x2e   :  { %852 = vmatpush3.xpose.msk.msra.mxu0 %vm53_vm0, %v23_v28 }
  0x2f   :  { %853 = vmatprep.subr.mxu0 %v941_v0 }
  0x32   :  { %854 = vmatpush3.xpose.msk.msra.mxu0 %vm53_vm0, %v22_v29 }
  0x33   :  { %855 = vmatprep.subr.mxu0 %v941_v0 }
  0x36   :  { %856 = vmatpush3.xpose.msk.msra.mxu0 %vm53_vm0, %v21_v30 }
  0x37   :  { %857 = vmatprep.subr.mxu0 %v941_v0 }
  0x3a   :  { %858 = vmatpush3.xpose.msk.msra.mxu0 %vm53_vm0, %v20_v31  ;;  %v776_v31 = vld [vmem:[%s1187_s0 + $0xa8] sm:$0xff] }
  0x3b   :  { %859 = vmatprep.subr.mxu0 %v941_v0 }
  0x3e   :  { %860 = vmatpush3.xpose.msk.msra.mxu0 %vm53_vm0, %v19_v32  ;;  %v777_v32 = vld [vmem:[%s1187_s0 + $0xb0] sm:$0xff] }
  0x41   :  { %862 = vmatmul.mubr.msk.f32.vlgmr.msra.gmra.mxu0 %vm53_vm0, %v16_v33  ;;  %v778_v33 = vld [vmem:[%s1187_s0 + $0xb8] sm:$0xff] }
  0x42   :  { %864 = vmatprep.mubr.msk.f32.mxu0 %vm942_vm1, %v941_v0 }
  0x45   :  { %865 = vmatmul.mubr.msk.f32.gmra.mxu0 %vm53_vm0, %v17_v34 }
  0x46   :  { %867 = vmatprep.mubr.msk.f32.mxu0 %vm942_vm1, %v941_v0 }
  0x49   :  { %868 = vmatmul.mubr.msk.f32.gmra.mxu0 %vm53_vm0, %v18_v35 }
  0x7f   :  { %v51_v38 = vpop.permute.xlu0 %50  ;;  %v41_v46 = vpop.permute.xlu1 %40 }
  0x83   :  { %v46_v42 = vpop.permute.xlu0 %45  ;;  %v208_v53 = vpop.permute.xlu1 %207 }
  0x87   :  { %v203_v56 = vpop.permute.xlu0 %202  ;;  %v301_v63 = vpop.permute.xlu1 %300 }
  0x8b   :  { %v392_v5 = vpop.permute.xlu0 %391  ;;  %v387_v8 = vpop.permute.xlu1 %386 }
  0x8f   :  { %v499_v19 = vpop.permute.xlu0 %498  ;;  %v494_v22 = vpop.permute.xlu1 %493 }
  0x93   :  { %v489_v25 = vpop.permute.xlu0 %488  ;;  %v606_v35 = vpop.permute.xlu1 %605 }
  0x97   :  { %v611_v34 = vpop.permute.xlu0 %610 }
 0x101   :  { %v177_v37 = vpop.f32.mrf.mxu0 }
 0x102   :  { %v178_v48 = vadd.f32 %v177_v37, %v41_v46 }
 0x103   :  { %v863_v39 = vpop.f32.mrf.mxu0 }
 0x105   :  { %v182_v40 = vpop.f32.mrf.mxu0 }
 0x106   :  { %v183_v44 = vadd.f32 %v182_v40, %v46_v42  ;;  %v621_v40 = vpop.permute.xlu0 %620 }
 0x107   :  { %v866_v41 = vpop.f32.mrf.mxu0 }
 0x109   :  { %v187_v43 = vpop.f32.mrf.mxu0 }
 0x10a   :  { %v188_v45 = vadd.f32 %v187_v43, %v51_v38  ;;  %v616_v43 = vpop.permute.xlu1 %615 }
 0x10b   :  { %v869_v47 = vpop.f32.mrf.mxu0 }
 0x10c   :  { %921 = vtanh.f32 %v188_v45 }
 0x10d   :  { %923 = vtanh.f32 %v183_v44 }
 0x10e   :  { %925 = vtanh.f32 %v178_v48 }
 0x119   :  { %v922_v49 = vpop.eup %921 }
 0x11a   :  { %870 = vmatprep.subr.mxu1 %v922_v49  ;;  %v924_v50 = vpop.eup %923 }
 0x11b   :  { %871 = vmatpush3.msra.mxu1 %v922_v49  ;;  %v926_v51 = vpop.eup %925 }
 0x11c   :  { %872 = vmatprep.subr.mxu1 %v924_v50 }
 0x11d   :  { %873 = vmatpush3.msra.mxu1 %v924_v50 }
 0x11e   :  { %874 = vmatprep.subr.mxu1 %v926_v51 }
 0x11f   :  { %875 = vmatpush3.msra.mxu1 %v926_v51 }
 0x120   :  { %877 = vmatmul.mubr.msk.f32.vlgmr.msra.gmra.mxu1 %vm210_vm2, %v752_v52  ;;  %879 = vmatprep.subr.mxu1 %v941_v0 }
 0x121   :  { %883 = vmatprep.mubr.msk.f32.mxu1 %vm942_vm1, %v941_v0 }
 0x1e0   :  { %v878_v54 = vpop.f32.mrf.mxu1 }
 0x1e1   :  { %v289_v55 = vadd.f32 %v878_v54, %v208_v53 }
 0x1e2   :  { %v283_v57 = vpop.f32.mrf.mxu1 }
 0x1e3   :  { %927 = vtanh.f32 %v289_v55  ;;  %v284_v58 = vadd.f32 %v283_v57, %v203_v56 }
 0x1e5   :  { %929 = vtanh.f32 %v284_v58 }
 0x1f0   :  { %v928_v59 = vpop.eup %927 }
 0x1f1   :  { %880 = vmatpush3.msra.mxu1 %v928_v59 }
 0x1f2   :  { %v930_v61 = vpop.eup %929  ;;  %881 = vmatprep.subr.mxu1 %v941_v0 }
 0x1f3   :  { %882 = vmatpush3.msra.mxu1 %v930_v61 }
 0x1f4   :  { %884 = vmatmul.mubr.msk.f32.vlgmr.msra.gmra.mxu1 %vm303_vm3, %v757_v60 }
 0x1f5   :  { %888 = vmatprep.mubr.msk.f32.mxu1 %vm394_vm4, %v760_v62 }
 0x2b4   :  { %v373_v1 = vpop.f32.mrf.mxu1 }
 0x2b5   :  { %v374_v2 = vadd.f32 %v373_v1, %v301_v63 }
 0x2b6   :  { %v885_v3 = vpop.f32.mrf.mxu1 }
 0x2b7   :  { %377 = vst [vmem:[%s1188_s3] sm:$0xff] %v374_v2  ;;  %886 = vmatprep.subr.mxu1 %v374_v2 }
 0x2b8   :  { %887 = vmatpush3.msra.mxu1 %v374_v2 }
 0x2b9   :  { %889 = vmatmul.mubr.msk.f32.vlgmr.msra.gmra.mxu1 %vm394_vm4, %v761_v4  ;;  %891 = vmatprep.subr.mxu1 %v941_v0 }
 0x2ba   :  { %895 = vmatprep.mubr.msk.f32.mxu1 %vm942_vm1, %v941_v0 }
 0x379   :  { %v890_v6 = vpop.f32.mrf.mxu1 }
 0x37a   :  { %v473_v7 = vadd.f32 %v890_v6, %v392_v5 }
 0x37b   :  { %v467_v9 = vpop.f32.mrf.mxu1 }
 0x37c   :  { %931 = vtanh.f32 %v473_v7  ;;  %v468_v10 = vadd.f32 %v467_v9, %v387_v8 }
 0x37e   :  { %933 = vtanh.f32 %v468_v10 }
 0x389   :  { %v932_v11 = vpop.eup %931 }
 0x38a   :  { %892 = vmatpush3.msra.mxu1 %v932_v11 }
 0x38b   :  { %v934_v13 = vpop.eup %933  ;;  %893 = vmatprep.subr.mxu1 %v941_v0 }
 0x38c   :  { %894 = vmatpush3.msra.mxu1 %v934_v13 }
 0x38d   :  { %896 = vmatmul.mubr.msk.f32.vlgmr.msra.gmra.mxu1 %vm303_vm3, %v766_v12 }
 0x38e   :  { %898 = vmatprep.mubr.msk.f32.mxu1 %vm942_vm1, %v941_v0 }
 0x391   :  { %899 = vmatmul.mubr.msk.f32.gmra.mxu1 %vm303_vm3, %v767_v14 }
 0x392   :  { %901 = vmatprep.mubr.msk.f32.mxu1 %vm942_vm1, %v941_v0 }
 0x395   :  { %902 = vmatmul.mubr.msk.f32.gmra.mxu1 %vm303_vm3, %v768_v15 }
 0x396   :  { %910 = vmatprep.mubr.msk.f32.mxu1 %vm210_vm2, %v775_v16 }
 0x44d   :  { %v576_v17 = vpop.f32.mrf.mxu1 }
 0x44e   :  { %v577_v27 = vadd.f32 %v576_v17, %v489_v25 }
 0x44f   :  { %v897_v18 = vpop.f32.mrf.mxu1 }
 0x451   :  { %v581_v20 = vpop.f32.mrf.mxu1 }
 0x452   :  { %v582_v0 = vadd.f32 %v581_v20, %v494_v22 }
 0x453   :  { %v900_v21 = vpop.f32.mrf.mxu1 }
 0x455   :  { %v586_v23 = vpop.f32.mrf.mxu1 }
 0x456   :  { %v587_v24 = vadd.f32 %v586_v23, %v499_v19 }
 0x457   :  { %v903_v26 = vpop.f32.mrf.mxu1 }
 0x458   :  { %935 = vtanh.f32 %v587_v24 }
 0x459   :  { %937 = vtanh.f32 %v582_v0 }
 0x45a   :  { %939 = vtanh.f32 %v577_v27 }
 0x465   :  { %v936_v28 = vpop.eup %935 }
 0x466   :  { %904 = vmatprep.subr.mxu1 %v936_v28  ;;  %v938_v29 = vpop.eup %937 }
 0x467   :  { %905 = vmatpush3.msra.mxu1 %v936_v28  ;;  %v940_v30 = vpop.eup %939 }
 0x468   :  { %906 = vmatprep.subr.mxu1 %v938_v29 }
 0x469   :  { %907 = vmatpush3.msra.mxu1 %v938_v29 }
 0x46a   :  { %908 = vmatprep.subr.mxu1 %v940_v30 }
 0x46b   :  { %909 = vmatpush3.msra.mxu1 %v940_v30 }
 0x46c   :  { %911 = vmatmul.mubr.msk.f32.vlgmr.msra.gmra.mxu1 %vm210_vm2, %v776_v31 }
 0x46d   :  { %913 = vmatprep.mubr.msk.f32.mxu1 %vm210_vm2, %v777_v32 }
 0x470   :  { %914 = vmatmul.mubr.msk.f32.gmra.mxu1 %vm210_vm2, %v778_v33 }
 0x52c   :  { %v912_v36 = vpop.f32.mrf.mxu1 }
 0x52d   :  { %v707_v37 = vadd.f32 %v912_v36, %v611_v34 }
 0x52e   :  { %v701_v38 = vpop.f32.mrf.mxu1 }
 0x52f   :  { %721 = vst [vmem:[%s1189_s4 + $0x8] sm:$0xff] %v707_v37  ;;  %v702_v39 = vadd.f32 %v701_v38, %v606_v35 }
 0x530   :  { %v915_v41 = vpop.f32.mrf.mxu1 }
 0x531   :  { %720 = vst [vmem:[%s1189_s4] sm:$0xff] %v702_v39  ;;  %v717_v42 = vadd.f32 %v915_v41, %v621_v40 }
 0x532   :  { %v711_v44 = vpop.f32.mrf.mxu1 }
 0x533   :  { %723 = vst [vmem:[%s1189_s4 + $0x18] sm:$0xff] %v717_v42  ;;  %v712_v45 = vadd.f32 %v711_v44, %v616_v43 }
 0x535   :  { %722 = vst [vmem:[%s1189_s4 + $0x10] sm:$0xff] %v712_v45 }

</bundles_post_ra>
